<compile_context>
chip_gen: v7x
topology: tpu7x:2x2x1
jax: 0.10.0
libtpu: 0.0.40
codegen_flags: <defaults>
</compile_context>

<pallas_src>
import functools
import math

import jax
import jax.numpy as jnp
from jax import lax
from jax.experimental import pallas as pl
from jax.experimental.pallas import tpu as pltpu

_INV_SQRT2 = 1.0 / math.sqrt(2.0)


def _round_up(x, m):
    return (x + m - 1) // m * m


def _vmem_capacity_bytes():
    """Physical VMEM per TensorCore (128 MiB v5e/v6e, 64 MiB v7x); conservative fallback."""
    try:
        info = pltpu.get_tpu_info()
        cap = int(getattr(info, "vmem_capacity_bytes", 0) or 0)
        if cap > 0:
            return cap
    except Exception:
        pass
    return 64 << 20


def _gelu_exact_f32(h):
    # exact erf-based GELU in f32 (torch.nn.GELU() default)
    return 0.5 * h * (1.0 + lax.erf(h * _INV_SQRT2))


# -----------------------------------------------------------------------------
# Kernel bodies
# -----------------------------------------------------------------------------
def _mlp_resident_kernel(x_ref, w1_ref, b1_ref, w2_ref, b2_ref, o_ref):
    """Weights fully VMEM-resident; one fused fc1->GELU->fc2 pass per M tile."""
    # fc1 on the MXU (native-dtype operands, f32 accumulation)
    h = jnp.dot(x_ref[...], w1_ref[...], preferred_element_type=jnp.float32)
    h = h + b1_ref[...].astype(jnp.float32)
    h = _gelu_exact_f32(h)
    # dropout (inference mode) -> identity
    y = jnp.dot(h.astype(w2_ref.dtype), w2_ref[...],
                preferred_element_type=jnp.float32)
    y = y + b2_ref[...].astype(jnp.float32)
    # dropout (inference mode) -> identity
    o_ref[...] = y.astype(o_ref.dtype)


def _mlp_kblocked_kernel(x_ref, w1_ref, b1_ref, w2_ref, b2_ref, o_ref, acc_ref):
    """Fallback for huge mlp_channel: stream (Din, tdm)/(tdm, Din) weight slabs over k."""
    k = pl.program_id(1)

    @pl.when(k == 0)
    def _():
        acc_ref[...] = jnp.zeros_like(acc_ref)

    h = jnp.dot(x_ref[...], w1_ref[...], preferred_element_type=jnp.float32)
    h = h + b1_ref[...].astype(jnp.float32)
    h = _gelu_exact_f32(h)
    # dropout (inference mode) -> identity
    acc_ref[...] += jnp.dot(h.astype(w2_ref.dtype), w2_ref[...],
                            preferred_element_type=jnp.float32)

    @pl.when(k == pl.num_programs(1) - 1)
    def _():
        y = acc_ref[...] + b2_ref[...].astype(jnp.float32)
        # dropout (inference mode) -> identity
        o_ref[...] = y.astype(o_ref.dtype)


# -----------------------------------------------------------------------------
# Trace-time tile / mode selection
# -----------------------------------------------------------------------------
def _select_config(M, Din_pad, Dm_pad, xbytes, wbytes, obytes, tile_m, tile_dm):
    cap = _vmem_capacity_bytes()
    # ~100 MiB on 128 MiB parts (v5e/v6e), ~48 MiB on 64 MiB parts (v7x)
    budget = min(100 << 20, cap - (16 << 20))
    vmem_limit = int(min(cap - (4 << 20), budget + (16 << 20)))

    m_aligned = _round_up(max(M, 1), 8)

    def cap_for_megacore(tm):
        # keep >= 2 parallel M tiles whenever possible (v7x: 2 TCs share the grid)
        if m_aligned >= 16:
            tm = min(tm, _round_up((m_aligned + 1) // 2, 8))
        return max(8, _round_up(tm, 8))

    # ---- resident-weights path ------------------------------------------------
    # W1+W2 in VMEM (counted double-buffered: grid-invariant operands are not
    # single-buffered here); per-row cost covers x/out double buffers, the f32
    # (tm, Dm) intermediate plus its w-dtype cast, and the f32 y temporary.
    resident_fixed = 2 * 2 * Din_pad * Dm_pad * wbytes + 4 * (Dm_pad + Din_pad) * wbytes
    resident_per_row = Din_pad * (2 * xbytes + 2 * obytes + 4) + Dm_pad * (4 + wbytes)

    tm_target = tile_m if tile_m is not None else 512
    tm = cap_for_megacore(min(_round_up(tm_target, 8), m_aligned))
    if resident_fixed + 8 * resident_per_row <= budget:
        tm_fit = max(8, ((budget - resident_fixed) // resident_per_row) // 8 * 8)
        tm = max(8, min(tm, tm_fit))
        return dict(mode="resident", tm=tm, tdm=Dm_pad, vmem_limit=vmem_limit)

    # ---- k-blocked fallback (huge Dm) -----------------------------------------
    tdm_target = tile_dm if tile_dm is not None else 1024
    tdm = 128
    for cand in (2048, 1024, 512, 256, 128):
        if cand > tdm_target or Dm_pad % cand:
            continue
        fixed = 2 * 2 * Din_pad * cand * wbytes + 4 * (cand + Din_pad) * wbytes
        per_row = Din_pad * (2 * xbytes + 2 * obytes + 4) + cand * (4 + wbytes)
        if fixed + 8 * per_row <= budget:
            tdm = cand
            break
    kfixed = 2 * 2 * Din_pad * tdm * wbytes + 4 * (tdm + Din_pad) * wbytes
    kper_row = Din_pad * (2 * xbytes + 2 * obytes + 4) + tdm * (4 + wbytes)
    # streamed weights want large M tiles (AI ~ 2*tm/bytes FLOP/B vs MXU ridge)
    tm_target = tile_m if tile_m is not None else 1024
    tm = cap_for_megacore(min(_round_up(tm_target, 8), m_aligned))
    tm_fit = max(8, ((budget - kfixed) // max(kper_row, 1)) // 8 * 8)
    tm = max(8, min(tm, tm_fit))
    return dict(mode="kblocked", tm=tm, tdm=tdm, vmem_limit=vmem_limit)


# -----------------------------------------------------------------------------
# Forward
# -----------------------------------------------------------------------------
@functools.partial(jax.jit, static_argnames=("tile_m", "tile_dm"))
def mlp_forward(x, w1_p, b1_p, w2_p, b2_p, tile_m=None, tile_dm=None):
    """x: (B, N, Din) unpadded activations.

    w1_p/b1_p/w2_p/b2_p must be pre-padded via prepare_params():
      w1_p: (Din_pad, Dm_pad), b1_p: (1, Dm_pad), w2_p: (Dm_pad, Din_pad), b2_p: (1, Din_pad).
    """
    B, N, Din = x.shape
    Din_pad, Dm_pad = w1_p.shape
    assert w2_p.shape == (Dm_pad, Din_pad)
    assert Din_pad == _round_up(Din, 128), "params were padded for a different in_channel"

    M = B * N
    cfg = _select_config(M, Din_pad, Dm_pad,
                         x.dtype.itemsize, w1_p.dtype.itemsize, x.dtype.itemsize,
                         tile_m, tile_dm)
    tm, tdm = cfg["tm"], cfg["tdm"]

    M_pad = _round_up(max(M, 1), tm)
    x2d = x.reshape(M, Din)
    needs_pad = (M_pad != M) or (Din_pad != Din)
    if needs_pad:
        # zero-padding is exact: gelu(0)=0 and zero weight rows/cols contribute nothing
        x2d = jnp.pad(x2d, ((0, M_pad - M), (0, Din_pad - Din)))

    cparams = pltpu.CompilerParams(
        dimension_semantics=("parallel",) if cfg["mode"] == "resident"
        else ("parallel", "arbitrary"),
        vmem_limit_bytes=cfg["vmem_limit"])

    if cfg["mode"] == "resident":
        out = pl.pallas_call(
            _mlp_resident_kernel,
            out_shape=jax.ShapeDtypeStruct((M_pad, Din_pad), x.dtype),
            grid_spec=pltpu.PrefetchScalarGridSpec(
                num_scalar_prefetch=0,
                grid=(M_pad // tm,),
                in_specs=[
                    pl.BlockSpec((tm, Din_pad), lambda i: (i, 0)),      # x tile (streamed)
                    pl.BlockSpec((Din_pad, Dm_pad), lambda i: (0, 0)),  # W1 (resident)
                    pl.BlockSpec((1, Dm_pad), lambda i: (0, 0)),        # b1 (resident)
                    pl.BlockSpec((Dm_pad, Din_pad), lambda i: (0, 0)),  # W2 (resident)
                    pl.BlockSpec((1, Din_pad), lambda i: (0, 0)),       # b2 (resident)
                ],
                out_specs=pl.BlockSpec((tm, Din_pad), lambda i: (i, 0)),
            ),
            compiler_params=cparams,
        )(x2d, w1_p, b1_p, w2_p, b2_p)
    else:
        out = pl.pallas_call(
            _mlp_kblocked_kernel,
            out_shape=jax.ShapeDtypeStruct((M_pad, Din_pad), x.dtype),
            grid_spec=pltpu.PrefetchScalarGridSpec(
                num_scalar_prefetch=0,
                grid=(M_pad // tm, Dm_pad // tdm),
                in_specs=[
                    pl.BlockSpec((tm, Din_pad), lambda i, k: (i, 0)),   # x tile
                    pl.BlockSpec((Din_pad, tdm), lambda i, k: (0, k)),  # W1 Dm-slab
                    pl.BlockSpec((1, tdm), lambda i, k: (0, k)),        # b1 Dm-slab
                    pl.BlockSpec((tdm, Din_pad), lambda i, k: (k, 0)),  # W2 Dm-slab
                    pl.BlockSpec((1, Din_pad), lambda i, k: (0, 0)),    # b2 (full)
                ],
                out_specs=pl.BlockSpec((tm, Din_pad), lambda i, k: (i, 0)),
                scratch_shapes=[pltpu.VMEM((tm, Din_pad), jnp.float32)],
            ),
            compiler_params=cparams,
        )(x2d, w1_p, b1_p, w2_p, b2_p)

    if needs_pad:
        out = out[:M, :Din]
    return out.reshape(B, N, Din)


# -----------------------------------------------------------------------------
# Parameter handling
# -----------------------------------------------------------------------------
def prepare_params(w1, b1, w2, b2):
    """Pad weights/biases to 128-lane multiples ONCE at load time (outside the jitted
    forward), so no per-call weight read+write round trip happens in HBM.

    Zero padding is mathematically exact (gelu(0)=0; zero rows/cols add nothing)."""
    Din, Dm = w1.shape
    Din_pad = _round_up(Din, 128)
    Dm_pad = _round_up(Dm, 128)
    b1 = jnp.asarray(b1).reshape(1, -1)
    b2 = jnp.asarray(b2).reshape(1, -1)
    w1_p = jnp.pad(w1, ((0, Din_pad - Din), (0, Dm_pad - Dm)))
    b1_p = jnp.pad(b1, ((0, 0), (0, Dm_pad - Dm)))
    w2_p = jnp.pad(w2, ((0, Dm_pad - Dm), (0, Din_pad - Din)))
    b2_p = jnp.pad(b2, ((0, 0), (0, Din_pad - Din)))
    return w1_p, b1_p, w2_p, b2_p


def init_params(key, in_channel, mlp_channel, dtype=jnp.float32):
    """Deterministic init mirroring Mlp._init_weights (xavier_uniform weights, normal(std=1e-6) biases)."""
    k1, k2, k3, k4 = jax.random.split(key, 4)

    def xavier_uniform(k, fan_in, fan_out):
        bound = math.sqrt(6.0 / (fan_in + fan_out))
        # stored as (fan_in, fan_out) = transpose of PyTorch's (out, in) layout
        return jax.random.uniform(k, (fan_in, fan_out), dtype=dtype,
                                  minval=-bound, maxval=bound)

    w1 = xavier_uniform(k1, in_channel, mlp_channel)
    b1 = (1e-6 * jax.random.normal(k2, (1, mlp_channel))).astype(dtype)
    w2 = xavier_uniform(k3, mlp_channel, in_channel)
    b2 = (1e-6 * jax.random.normal(k4, (1, in_channel))).astype(dtype)
    return w1, b1, w2, b2


if __name__ == "__main__":
    # Small transformer-like shapes: batch=2, seq=8, in_channel=32, mlp_channel=64
    B, N, IN_CH, MLP_CH = 2, 8, 32, 64

    key = jax.random.PRNGKey(0)
    kx, kp = jax.random.split(key)
    x = jax.random.normal(kx, (B, N, IN_CH), dtype=jnp.float32)
    w1, b1, w2, b2 = init_params(kp, IN_CH, MLP_CH)

    # One-time padding outside the per-call path (per review).
    params = prepare_params(w1, b1, w2, b2)

    y = mlp_forward(x, *params)
    jax.block_until_ready(y)

    # Pure-JAX reference check (eval-mode dropout == identity)
    h_ref = x.reshape(-1, IN_CH) @ w1 + b1
    h_ref = 0.5 * h_ref * (1.0 + lax.erf(h_ref / math.sqrt(2.0)))
    y_ref = (h_ref @ w2 + b2).reshape(B, N, IN_CH)
    assert jnp.allclose(y, y_ref, atol=1e-5, rtol=1e-5), "mismatch vs reference"

    print("KERNEL_OK")
</pallas_src>

<mosaic_0001>
module attributes {stable_mosaic.version = 11 : i64} {
  func.func @_mlp_resident_kernel(%arg0: i32, %arg1: memref<8x128xf32, #tpu.memory_space<vmem>>, %arg2: memref<128x128xf32, #tpu.memory_space<vmem>>, %arg3: memref<1x128xf32, #tpu.memory_space<vmem>>, %arg4: memref<128x128xf32, #tpu.memory_space<vmem>>, %arg5: memref<1x128xf32, #tpu.memory_space<vmem>>, %arg6: memref<8x128xf32, #tpu.memory_space<vmem>>) attributes {dimension_semantics = [#tpu.dimension_semantics<parallel>], iteration_bounds = array<i64: 2>, scalar_prefetch = 0 : i64, scratch_operands = 0 : i64, tpu.core_type = #tpu.core_type<tc>, window_params = [{transform_indices = @transform_0, window_bounds = array<i64: 8, 128>}, {pipeline_mode = #tpu.pipeline_mode<synchronous>, transform_indices = @transform_1, window_bounds = array<i64: 128, 128>}, {pipeline_mode = #tpu.pipeline_mode<synchronous>, transform_indices = @transform_2, window_bounds = array<i64: 1, 128>}, {pipeline_mode = #tpu.pipeline_mode<synchronous>, transform_indices = @transform_3, window_bounds = array<i64: 128, 128>}, {pipeline_mode = #tpu.pipeline_mode<synchronous>, transform_indices = @transform_4, window_bounds = array<i64: 1, 128>}, {transform_indices = @transform_5, window_bounds = array<i64: 8, 128>}]} {
    %c0 = arith.constant 0 : index
    %c0_0 = arith.constant 0 : index
    %0 = vector.load %arg1[%c0, %c0_0] : memref<8x128xf32, #tpu.memory_space<vmem>>, vector<8x128xf32>
    %c0_1 = arith.constant 0 : index
    %c0_2 = arith.constant 0 : index
    %1 = vector.load %arg2[%c0_1, %c0_2] : memref<128x128xf32, #tpu.memory_space<vmem>>, vector<128x128xf32>
    %cst = arith.constant dense<0.000000e+00> : vector<8x128xf32>
    %2 = tpu.matmul %0, %1, %cst {dimension_numbers = #tpu.dot_dimension_numbers<[1], [0], [0], [1], [0, 0, 1, 1], [], []>} : vector<8x128xf32>, vector<128x128xf32>, vector<8x128xf32> -> vector<8x128xf32>
    %c0_3 = arith.constant 0 : index
    %c0_4 = arith.constant 0 : index
    %3 = vector.load %arg3[%c0_3, %c0_4] : memref<1x128xf32, #tpu.memory_space<vmem>>, vector<1x128xf32>
    %4 = vector.broadcast %3 : vector<1x128xf32> to vector<8x128xf32>
    %5 = arith.addf %2, %4 : vector<8x128xf32>
    %cst_5 = arith.constant 5.000000e-01 : f32
    %6 = vector.broadcast %cst_5 : f32 to vector<8x128xf32>
    %7 = arith.mulf %6, %5 : vector<8x128xf32>
    %cst_6 = arith.constant 0.707106769 : f32
    %8 = vector.broadcast %cst_6 : f32 to vector<8x128xf32>
    %9 = arith.mulf %5, %8 : vector<8x128xf32>
    %10 = math.erf %9 : vector<8x128xf32>
    %cst_7 = arith.constant 1.000000e+00 : f32
    %11 = vector.broadcast %cst_7 : f32 to vector<8x128xf32>
    %12 = arith.addf %11, %10 : vector<8x128xf32>
    %13 = arith.mulf %7, %12 : vector<8x128xf32>
    %c0_8 = arith.constant 0 : index
    %c0_9 = arith.constant 0 : index
    %14 = vector.load %arg4[%c0_8, %c0_9] : memref<128x128xf32, #tpu.memory_space<vmem>>, vector<128x128xf32>
    %cst_10 = arith.constant dense<0.000000e+00> : vector<8x128xf32>
    %15 = tpu.matmul %13, %14, %cst_10 {dimension_numbers = #tpu.dot_dimension_numbers<[1], [0], [0], [1], [0, 0, 1, 1], [], []>} : vector<8x128xf32>, vector<128x128xf32>, vector<8x128xf32> -> vector<8x128xf32>
    %c0_11 = arith.constant 0 : index
    %c0_12 = arith.constant 0 : index
    %16 = vector.load %arg5[%c0_11, %c0_12] : memref<1x128xf32, #tpu.memory_space<vmem>>, vector<1x128xf32>
    %17 = vector.broadcast %16 : vector<1x128xf32> to vector<8x128xf32>
    %18 = arith.addf %15, %17 : vector<8x128xf32>
    %c0_13 = arith.constant 0 : index
    %c0_14 = arith.constant 0 : index
    %19 = vector.load %arg6[%c0_13, %c0_14] : memref<8x128xf32, #tpu.memory_space<vmem>>, vector<8x128xf32>
    tpu.vector_store %arg6[%c0_13, %c0_14], %18 {strides = array<i32>} : memref<8x128xf32, #tpu.memory_space<vmem>>, vector<8x128xf32>,
    return
  }
  func.func @transform_0(%arg0: i32) -> (i32, i32) {
    %c0_i32 = arith.constant 0 : i32
    %c0_i32_0 = arith.constant 0 : i32
    return %arg0, %c0_i32 : i32, i32
  }
  func.func @transform_1(%arg0: i32) -> (i32, i32) {
    %c0_i32 = arith.constant 0 : i32
    %c0_i32_0 = arith.constant 0 : i32
    %c0_i32_1 = arith.constant 0 : i32
    return %c0_i32, %c0_i32_0 : i32, i32
  }
  func.func @transform_2(%arg0: i32) -> (i32, i32) {
    %c0_i32 = arith.constant 0 : i32
    %c0_i32_0 = arith.constant 0 : i32
    %c0_i32_1 = arith.constant 0 : i32
    return %c0_i32, %c0_i32_0 : i32, i32
  }
  func.func @transform_3(%arg0: i32) -> (i32, i32) {
    %c0_i32 = arith.constant 0 : i32
    %c0_i32_0 = arith.constant 0 : i32
    %c0_i32_1 = arith.constant 0 : i32
    return %c0_i32, %c0_i32_0 : i32, i32
  }
  func.func @transform_4(%arg0: i32) -> (i32, i32) {
    %c0_i32 = arith.constant 0 : i32
    %c0_i32_0 = arith.constant 0 : i32
    %c0_i32_1 = arith.constant 0 : i32
    return %c0_i32, %c0_i32_0 : i32, i32
  }
  func.func @transform_5(%arg0: i32) -> (i32, i32) {
    %c0_i32 = arith.constant 0 : i32
    %c0_i32_0 = arith.constant 0 : i32
    return %arg0, %c0_i32 : i32, i32
  }
}

</mosaic_0001>

<bundles_post_ra>
// kernel: mlp_forward.1
= control target key start
LH: loop header
LB: loop body
LE: loop exit
PB: predicated region body
PF: predicated region fallthrough
CT: control target
= control target key end

     0   :  { %10 = vsyncpa [#allocation3], 0  ;;  %s952_s0 = inlined_call_operand.vmem [shape: f32[16,128], index: 0, kind: input, shape index: {}]   ;;  %s953_s1 = inlined_call_operand.hbm [shape: f32[128,128], index: 1, kind: input, shape index: {}]   ;;  %s954_s2 = inlined_call_operand.vmem [shape: f32[1,128], index: 2, kind: input, shape index: {}]   ;;  %s955_s3 = inlined_call_operand.hbm [shape: f32[128,128], index: 3, kind: input, shape index: {}]   ;;  %s956_s4 = inlined_call_operand.vmem [shape: f32[1,128], index: 4, kind: input, shape index: {}]   ;;  %s957_s5 = inlined_call_operand.vmem [shape: f32[16,128], index: 5, kind: output, shape index: {}]  }
   0x1   :  { %11 = vsyncpa [#allocation5], 0  ;;  %s830_s18 = smov 0  }
   0x2 LB: > { %s836_s19 = sadd.s32 4294967295, %s791_s18   ;;  %p520_p0 = scmp.ge.s32.totalorder %s791_s18, 1  ;;  %s791_s18 = sphi %s830_s18, %s17_s18  }
   0x3   : > { %p158_p1 = scmp.lt.s32.totalorder %s791_s18, 3  ;;  %s793_s20 = smov [#allocation2]  }
   0x4   : > { %s170_s21 = sshll.u32 %s793_s20, 4  ;;  %p958_p3 = scmp.eq.s32.totalorder %s836_s19, 0  ;;  %s171_s21 = int_to_ptr.vmem [resolvable:$true] %s170_s21 }
   0x5   : > { %p840_p2 = pnand %p520_p0, %p158_p1  ;;  %s794_s23 = smov [#allocation4]  }
   0x6   : > { %s186_s24 = sshll.u32 %s794_s23, 4  ;;  %s721_s28 = scalar_lea.hbm %s953_s1, 2048  ;;  %s853_s24 = int_to_ptr.vmem [resolvable:$true] %s186_s24 }
   0x7   : > { %s960_s22 = scalar_select %p840_p2, 1, 0 }
   0x8   : > { %p693_p4 = pneg %p840_p2  ;;  %p722_p6 = scmp.ne.s32.totalorder %s953_s1, %s721_s28 }
   0x9   : > { %p728_p10 = scmp.lt.u32.totalorder %s721_s28, %s953_s1 }
   0xa   : > { %p849_p5 = pnand %p958_p3, %p693_p4 }
   0xc   : > { %p723_p7 = pneg %p849_p5 }
   0xe   : > { %p724_p8 = pnand %p723_p7, %p722_p6 }
  0x10   : > { %p725_p9 = pneg %p724_p8 }
  0x12   : > { %p730_p11 = pnand %p728_p10, %p725_p9 }
  0x14   : > { %733 = shalt.err (!%p730_p11)
}
  0x15   : > { %s734_s8 = scalar_lea.vmem %s171_s21, 2048  ;;  %p742_p1 = scmp.lt.s32.totalorder %s171_s21, %s171_s21 }
  0x16   : > { %p735_p12 = scmp.ne.s32.totalorder %s171_s21, %s734_s8  ;;  %p743_p4 = scmp.lt.s32.totalorder %s734_s8, %s734_s8 }
  0x18   : > { %p737_p13 = pnand %p735_p12, %p723_p7  ;;  %p744_p3 = por %p743_p4, %p742_p1 }
  0x1a   : > { %p738_p0 = pneg %p737_p13 }
  0x1c   : > { %p745_p2 = pnand %p744_p3, %p738_p0 }
  0x1e   : > { %748 = shalt.err (!%p745_p2)
}
  0x1f   : > { %s795_s9 = smov 128   ;;  %s796_s10 = smov 8  }
  0x20   : > { %696 = dma.hbm_to_vmem [thread:$0]  (!%p849_p5), %s953_s1, 2048, %s171_s21, [#allocation3], %s795_s9, %s795_s9, %s796_s10  }
  0x21   : > { %s749_s15 = scalar_lea.hbm %s955_s3, 2048 }
  0x22   : > { %p750_p6 = scmp.ne.s32.totalorder %s955_s3, %s749_s15  ;;  %p756_p8 = scmp.lt.u32.totalorder %s749_s15, %s955_s3 }
  0x24   : > { %p752_p2 = pnand %p750_p6, %p723_p7 }
  0x26   : > { %p753_p3 = pneg %p752_p2 }
  0x28   : > { %p758_p9 = pnand %p756_p8, %p753_p3 }
  0x2a   : > { %761 = shalt.err (!%p758_p9)
}
  0x2b   : > { %s762_s21 = scalar_lea.vmem %s853_s24, 2048  ;;  %p770_p13 = scmp.lt.s32.totalorder %s853_s24, %s853_s24 }
  0x2c   : > { %p763_p10 = scmp.ne.s32.totalorder %s853_s24, %s762_s21  ;;  %p771_p0 = scmp.lt.s32.totalorder %s762_s21, %s762_s21 }
  0x2e   : > { %p765_p11 = pnand %p763_p10, %p723_p7  ;;  %p772_p1 = por %p771_p0, %p770_p13 }
  0x30   : > { %p766_p12 = pneg %p765_p11 }
  0x32   : > { %p773_p4 = pnand %p772_p1, %p766_p12 }
  0x34   : > { %776 = shalt.err (!%p773_p4)
}
  0x35   : > { %699 = dma.hbm_to_vmem [thread:$0]  (!%p849_p5), %s955_s3, 2048, %s853_s24, [#allocation5], %s795_s9, %s795_s9, %s796_s10  }
  0x36   : > { %p962_p6 = scmp.ne.s32.totalorder %s960_s22, 0 }
  0x37   : > { %p963_p2 = scmp.eq.s32.totalorder (!%p962_p6), %s836_s19, 0 }
  0x38   : > { %212 = sbr.rel (%p962_p6) target bundleno = 547 (0x223), region = 40 }
  0x3f   : > { %782 = dma.done.wait (%p963_p2), [#allocation3], 2048   ;;  %p964_p7 = pmov %p963_p2 }
  0x40   : > { %p965_p3 = pmov %p963_p2 }
  0x41   : > { %784 = vsyncadd (%p964_p7), [#allocation3], 4294965248 }
  0x42   : > { %786 = dma.done.wait (%p965_p3), [#allocation5], 2048   ;;  %p966_p8 = pmov %p963_p2 }
  0x43   : > { %v797_v0 = vmov 0.0|0.0   ;;  %vm798_vm0 = vmmov 0   ;;  %v799_v1 = vmov 0.0   ;;  %v251_v2 = vld [vmem:[#allocation2] sm:$0xff]  ;;  %v252_v3 = vld [vmem:[#allocation2 + $0x8] sm:$0xff]  ;;  %v253_v4 = vld [vmem:[#allocation2 + $0x10] sm:$0xff] }
  0x44   : > { %788 = vsyncadd (%p966_p8), [#allocation5], 4294965248  ;;  %637 = vmatprep.subr.bf16.mxu0 %v797_v0  ;;  %599 = vmatprep.mubr.msk.f32.mxu0 %vm798_vm0, %v799_v1  ;;  %v638_v5 = vpack.c.bf16 %v252_v3, %v251_v2  ;;  %v254_v6 = vld [vmem:[#allocation2 + $0x18] sm:$0xff]  ;;  %v255_v8 = vld [vmem:[#allocation2 + $0x20] sm:$0xff]  ;;  %p242_p5 = scmp.lt.s32.totalorder %s836_s19, 1 }
  0x45   : > { %661 = vmatprep.subr.bf16.mxu1 %v797_v0  ;;  %634 = vmatprep.mubr.msk.f32.mxu1 %vm798_vm0, %v799_v1  ;;  %v641_v7 = vpack.c.bf16 %v254_v6, %v253_v4  ;;  %v256_v9 = vld [vmem:[#allocation2 + $0x28] sm:$0xff]  ;;  %v349_v10 = vld [vmem:[#allocation4] sm:$0xff]  ;;  %v351_v12 = vld [vmem:[#allocation4 + $0x10] sm:$0xff] }
  0x46   : > { %639 = vmatpush3.bf16.msra.mxu0 %v638_v5  ;;  %v350_v11 = vld [vmem:[#allocation4 + $0x8] sm:$0xff]  ;;  %v352_v13 = vld [vmem:[#allocation4 + $0x18] sm:$0xff]  ;;  %v644_v14 = vpack.c.bf16 %v256_v9, %v255_v8  ;;  %v257_v16 = vld [vmem:[#allocation2 + $0x30] sm:$0xff]  ;;  %s968_s19 = smov (!%p242_p5, %s836_s19), 1 }
  0x47   : > { %640 = vmatprep.subr.bf16.mxu0 %v797_v0  ;;  %v662_v15 = vpack.c.bf16 %v350_v11, %v349_v10  ;;  %v258_v17 = vld [vmem:[#allocation2 + $0x38] sm:$0xff]  ;;  %v665_v18 = vpack.c.bf16 %v352_v13, %v351_v12  ;;  %v353_v19 = vld [vmem:[#allocation4 + $0x20] sm:$0xff]  ;;  %v354_v20 = vld [vmem:[#allocation4 + $0x28] sm:$0xff]  ;;  %s527_s22 = sshll.u32 %s968_s19, 3 }
  0x48   : > { %v647_v21 = vpack.c.bf16 %v258_v17, %v257_v16  ;;  %v259_v22 = vld [vmem:[#allocation2 + $0x40] sm:$0xff]  ;;  %v260_v23 = vld [vmem:[#allocation2 + $0x48] sm:$0xff]  ;;  %v668_v24 = vpack.c.bf16 %v354_v20, %v353_v19  ;;  %v261_v26 = vld [vmem:[#allocation2 + $0x50] sm:$0xff]  ;;  %s245_s28 = scalar_lea.vmem %s952_s0, %s527_s22  ;;  %s249_s10 = scalar_lea.vmem %s957_s5, %s527_s22 }
  0x49   : > { %663 = vmatpush3.bf16.msra.mxu1 %v662_v15  ;;  %v650_v25 = vpack.c.bf16 %v260_v23, %v259_v22  ;;  %v262_v27 = vld [vmem:[#allocation2 + $0x58] sm:$0xff]  ;;  %v263_v29 = vld [vmem:[#allocation2 + $0x60] sm:$0xff]  ;;  %v264_v30 = vld [vmem:[#allocation2 + $0x68] sm:$0xff] }
  0x4a   : > { %642 = vmatpush3.bf16.msra.mxu0 %v641_v7  ;;  %664 = vmatprep.subr.bf16.mxu1 %v797_v0  ;;  %v653_v28 = vpack.c.bf16 %v262_v27, %v261_v26  ;;  %v656_v31 = vpack.c.bf16 %v264_v30, %v263_v29  ;;  %v265_v32 = vld [vmem:[#allocation2 + $0x70] sm:$0xff]  ;;  %v266_v33 = vld [vmem:[#allocation2 + $0x78] sm:$0xff]  ;;  %v250_v35 = vld [vmem:[%s245_s28] sm:$0xff] }
  0x4b   : > { %643 = vmatprep.subr.bf16.mxu0 %v797_v0  ;;  %v659_v34 = vpack.c.bf16 %v266_v33, %v265_v32  ;;  %v355_v36 = vld [vmem:[#allocation4 + $0x30] sm:$0xff]  ;;  %v356_v37 = vld [vmem:[#allocation4 + $0x38] sm:$0xff]  ;;  %v357_v39 = vld [vmem:[#allocation4 + $0x40] sm:$0xff] }
  0x4c   : > { %v671_v38 = vpack.c.bf16 %v356_v37, %v355_v36  ;;  %v358_v40 = vld [vmem:[#allocation4 + $0x48] sm:$0xff]  ;;  %v359_v42 = vld [vmem:[#allocation4 + $0x50] sm:$0xff]  ;;  %v360_v43 = vld [vmem:[#allocation4 + $0x58] sm:$0xff] }
  0x4d   : > { %666 = vmatpush3.bf16.msra.mxu1 %v665_v18  ;;  %v674_v41 = vpack.c.bf16 %v358_v40, %v357_v39  ;;  %v677_v44 = vpack.c.bf16 %v360_v43, %v359_v42  ;;  %v361_v45 = vld [vmem:[#allocation4 + $0x60] sm:$0xff]  ;;  %v362_v46 = vld [vmem:[#allocation4 + $0x68] sm:$0xff]  ;;  %v363_v48 = vld [vmem:[#allocation4 + $0x70] sm:$0xff] }
  0x4e   : > { %645 = vmatpush3.bf16.msra.mxu0 %v644_v14  ;;  %667 = vmatprep.subr.bf16.mxu1 %v797_v0  ;;  %v680_v47 = vpack.c.bf16 %v362_v46, %v361_v45  ;;  %v364_v49 = vld [vmem:[#allocation4 + $0x78] sm:$0xff]  ;;  %v529_v51 = vld [vmem:[%s954_s2] ss:$0 sm:$0xff] }
  0x4f   : > { %646 = vmatprep.subr.bf16.mxu0 %v797_v0  ;;  %v683_v50 = vpack.c.bf16 %v364_v49, %v363_v48  ;;  %v530_v60 = vld [vmem:[%s956_s4] ss:$0 sm:$0xff] }
  0x51   : > { %669 = vmatpush3.bf16.msra.mxu1 %v668_v24 }
  0x52   : > { %648 = vmatpush3.bf16.msra.mxu0 %v647_v21  ;;  %670 = vmatprep.subr.bf16.mxu1 %v797_v0 }
  0x53   : > { %649 = vmatprep.subr.bf16.mxu0 %v797_v0 }
  0x55   : > { %672 = vmatpush3.bf16.msra.mxu1 %v671_v38 }
  0x56   : > { %651 = vmatpush3.bf16.msra.mxu0 %v650_v25  ;;  %673 = vmatprep.subr.bf16.mxu1 %v797_v0 }
  0x57   : > { %652 = vmatprep.subr.bf16.mxu0 %v797_v0 }
  0x59   : > { %675 = vmatpush3.bf16.msra.mxu1 %v674_v41 }
  0x5a   : > { %654 = vmatpush3.bf16.msra.mxu0 %v653_v28  ;;  %676 = vmatprep.subr.bf16.mxu1 %v797_v0 }
  0x5b   : > { %655 = vmatprep.subr.bf16.mxu0 %v797_v0 }
  0x5d   : > { %678 = vmatpush3.bf16.msra.mxu1 %v677_v44 }
  0x5e   : > { %657 = vmatpush3.bf16.msra.mxu0 %v656_v31  ;;  %679 = vmatprep.subr.bf16.mxu1 %v797_v0 }
  0x5f   : > { %658 = vmatprep.subr.bf16.mxu0 %v797_v0 }
  0x61   : > { %681 = vmatpush3.bf16.msra.mxu1 %v680_v47 }
  0x62   : > { %660 = vmatpush3.bf16.msra.mxu0 %v659_v34  ;;  %682 = vmatprep.subr.bf16.mxu1 %v797_v0 }
  0x65   : > { %600 = vmatmul.mubr.f32.vlgmr.msra.gmra.mrb[0].mxu0 %v250_v35  ;;  %684 = vmatpush3.bf16.msra.mxu1 %v683_v50 }
 0x138   : > { %v340_v52 = vpop.f32.mrb[0].mxu0 }
 0x139   : > { %v341_v53 = vadd.f32 %v529_v51, %v340_v52  ;;  %v601_v54 = vpop.f32.mrb[1].mxu0 }
 0x13b   : > { %v345_v55 = vmul.f32 0.70710677, %v341_v53  ;;  %v344_v57 = vmul.f32 0.5, %v341_v53 }
 0x13d   : > { %719 = verf.f32 %v345_v55 }
 0x147   : > { %v720_v56 = vpop.eup %719 }
 0x148   : > { %v347_v58 = vadd.f32 1.0, %v720_v56 }
 0x14a   : > { %v348_v59 = vmul.f32 %v347_v58, %v344_v57 }
 0x14c   : > { %635 = vmatmul.mubr.f32.vlgmr.msra.gmra.mrb[0].mxu1 %v348_v59 }
 0x21f   : > { %v438_v61 = vpop.f32.mrb[0].mxu1 }
 0x220   : > { %v439_v62 = vadd.f32 %v530_v60, %v438_v61  ;;  %v636_v63 = vpop.f32.mrb[1].mxu1 }
 0x222   : > { %442 = vst [vmem:[%s249_s10] sm:$0xff] %v439_v62 }
 0x223 PF: > { %s17_s18 = sadd.s32 1, %s791_s18  }
 0x224   : > { %p14_p9 = scmp.ge.s32.totalorder %s17_s18, 4  }
 0x226   :  { %16 = sbr.rel (!%p14_p9) target bundleno = 2 (0x2), region = 79 }
 0x22d   :  { %462 = vsyncpa [#allocation3], 1 }
 0x22e   :  { %464 = vsyncpa [#allocation3 + $0x1], 1 }
 0x22f   :  { %465 = vsyncpa [#allocation5], 1 }

</bundles_post_ra>
